<compile_context>
chip_gen: v6e
topology: v6e:2x2x1
jax: 0.10.0
libtpu: 0.0.40
codegen_flags: <defaults>
</compile_context>

<pallas_src>
import functools

import jax
import jax.numpy as jnp
from jax.experimental import pallas as pl
from jax.experimental.pallas import tpu as pltpu

IN_FEATURES = 28 * 28        # 784 (== full array dim; no K padding needed)
HIDDEN = 512
OUT_FEATURES = 10
OUT_PAD = 128                # lane-dense output width; sliced to 10 in the wrapper


def _mlp_kernel(x_ref, w1_ref, b1_ref, w2_ref, b2_ref, o_ref):
    """Fused MLP hot path: (bf16 matmul + f32 bias + ReLU) x 2, all in VMEM."""
    # In-kernel f32 -> bf16 cast (VPU) instead of a wrapper-side pad/copy pass.
    x = x_ref[...].astype(jnp.bfloat16)
    h = jnp.dot(x, w1_ref[...], preferred_element_type=jnp.float32)   # MXU, f32 acc
    h = jnp.maximum(h + b1_ref[...], 0.0)                             # bias + ReLU on VPU
    y = jnp.dot(h.astype(jnp.bfloat16), w2_ref[...],
                preferred_element_type=jnp.float32)
    o_ref[...] = jnp.maximum(y + b2_ref[...], 0.0).astype(o_ref.dtype)


def prepare_params(w1, b1, w2, b2):
    """One-time parameter prep: bf16 casts + lane-padding of the 10-wide output.

    Call once; reuse the result across forward calls (no per-call pad traffic).
    """
    w1_p = w1.astype(jnp.bfloat16)                                    # (784, 512)
    b1_p = b1.reshape(1, HIDDEN).astype(jnp.float32)                  # (1, 512)
    w2_p = jnp.zeros((HIDDEN, OUT_PAD), jnp.bfloat16)
    w2_p = w2_p.at[:, :OUT_FEATURES].set(w2.astype(jnp.bfloat16))     # (512, 128)
    b2_p = jnp.zeros((1, OUT_PAD), jnp.float32)
    b2_p = b2_p.at[:, :OUT_FEATURES].set(
        b2.reshape(1, OUT_FEATURES).astype(jnp.float32))              # (1, 128)
    return w1_p, b1_p, w2_p, b2_p


@functools.partial(jax.jit, static_argnames=("block_b",))
def _forward(x, w1_p, b1_p, w2_p, b2_p, *, block_b):
    """x: (N, 28, 28) or (N, 1, 28, 28) float32 -> (N, 10) float32."""
    n = x.shape[0]
    x2d = x.reshape(n, -1)                                            # Flatten (glue, plain JAX)
    assert x2d.shape[1] == IN_FEATURES

    n_blocks = pl.cdiv(n, block_b)                                    # partial last block is fine:
                                                                      # OOB rows read garbage, their
                                                                      # output stores are masked.
    out = pl.pallas_call(
        _mlp_kernel,
        out_shape=jax.ShapeDtypeStruct((n, OUT_PAD), jnp.float32),
        grid_spec=pltpu.PrefetchScalarGridSpec(
            num_scalar_prefetch=0,
            grid=(n_blocks,),
            in_specs=[
                # activations: tiled over batch; 784 == full dim (no 128-divisibility needed)
                pl.BlockSpec((block_b, IN_FEATURES), lambda i: (i, 0)),
                # weights / biases: whole arrays resident in VMEM (constant index_map =>
                # no re-DMA per grid step)
                pl.BlockSpec((IN_FEATURES, HIDDEN), lambda i: (0, 0)),
                pl.BlockSpec((1, HIDDEN), lambda i: (0, 0)),
                pl.BlockSpec((HIDDEN, OUT_PAD), lambda i: (0, 0)),
                pl.BlockSpec((1, OUT_PAD), lambda i: (0, 0)),
            ],
            out_specs=pl.BlockSpec((block_b, OUT_PAD), lambda i: (i, 0)),
        ),
        compiler_params=pltpu.CompilerParams(
            dimension_semantics=("parallel",),        # megacore sharding on v7x
            vmem_limit_bytes=32 * 1024 * 1024,        # ~7 MiB used at block_b=512; headroom for sweeps
        ),
    )(x2d, w1_p, b1_p, w2_p, b2_p)

    # Strip lane padding only (no batch padding to strip).
    return out[:, :OUT_FEATURES]


def mynet_forward(x, params, *, block_b=None):
    """Non-jitted wrapper: picks a static block_b from the (static) batch size."""
    if block_b is None:
        n = x.shape[0]
        # >= 2 grid steps when N allows it (keeps both v7x TensorCores busy), cap at 512.
        block_b = min(512, max(8, ((pl.cdiv(n, 2) + 7) // 8) * 8))
    # TODO(synk): if the caller can cache x in bf16, read bf16 directly (v5e roofline lever).
    return _forward(x, *params, block_b=block_b)


def init_params(key):
    """Deterministic init mimicking nn.Linear default: U(-1/sqrt(fan_in), 1/sqrt(fan_in))."""
    k1, k2, k3, k4 = jax.random.split(key, 4)
    lim1 = 1.0 / jnp.sqrt(jnp.float32(IN_FEATURES))
    lim2 = 1.0 / jnp.sqrt(jnp.float32(HIDDEN))
    w1 = jax.random.uniform(k1, (IN_FEATURES, HIDDEN), jnp.float32, -lim1, lim1)
    b1 = jax.random.uniform(k2, (HIDDEN,), jnp.float32, -lim1, lim1)
    w2 = jax.random.uniform(k3, (HIDDEN, OUT_FEATURES), jnp.float32, -lim2, lim2)
    b2 = jax.random.uniform(k4, (OUT_FEATURES,), jnp.float32, -lim2, lim2)
    return w1, b1, w2, b2


if __name__ == "__main__":
    key = jax.random.PRNGKey(0)
    kx, kp = jax.random.split(key)

    # Small, forward-consistent input: batch of 8 MNIST-shaped images.
    batch = 8
    x = jax.random.normal(kx, (batch, 28, 28), jnp.float32)
    w1, b1, w2, b2 = init_params(kp)

    params = prepare_params(w1, b1, w2, b2)       # one-time prep, reused across calls
    out = jax.block_until_ready(mynet_forward(x, params))
    assert out.shape == (batch, OUT_FEATURES)

    # Precision-matched reference (same bf16 casts, f32 accumulation) in plain JAX.
    xb = x.reshape(batch, -1).astype(jnp.bfloat16)
    h_ref = jnp.maximum(
        jnp.dot(xb, w1.astype(jnp.bfloat16), preferred_element_type=jnp.float32)
        + b1[None, :], 0.0)
    y_ref = jnp.maximum(
        jnp.dot(h_ref.astype(jnp.bfloat16), w2.astype(jnp.bfloat16),
                preferred_element_type=jnp.float32) + b2[None, :], 0.0)
    assert jnp.allclose(out, y_ref, atol=1e-3, rtol=1e-3)

    # Loose sanity check against the full-f32 reference (bf16 quantization only).
    ref_f32 = jnp.maximum(
        jnp.maximum(x.reshape(batch, -1) @ w1 + b1[None, :], 0.0) @ w2 + b2[None, :], 0.0)
    assert jnp.allclose(out, ref_f32, atol=5e-2, rtol=5e-2)

    print("KERNEL_OK")
</pallas_src>

<mosaic_0001>
module attributes {stable_mosaic.version = 11 : i64} {
  func.func @_mlp_kernel(%arg0: i32, %arg1: memref<8x784xf32, #tpu.memory_space<vmem>>, %arg2: memref<784x512xbf16, #tpu.memory_space<vmem>>, %arg3: memref<1x512xf32, #tpu.memory_space<vmem>>, %arg4: memref<512x128xbf16, #tpu.memory_space<vmem>>, %arg5: memref<1x128xf32, #tpu.memory_space<vmem>>, %arg6: memref<8x128xf32, #tpu.memory_space<vmem>>) attributes {dimension_semantics = [#tpu.dimension_semantics<parallel>], iteration_bounds = array<i64: 1>, scalar_prefetch = 0 : i64, scratch_operands = 0 : i64, tpu.core_type = #tpu.core_type<tc>, window_params = [{transform_indices = @transform_0, window_bounds = array<i64: 8, 784>}, {pipeline_mode = #tpu.pipeline_mode<synchronous>, transform_indices = @transform_1, window_bounds = array<i64: 784, 512>}, {pipeline_mode = #tpu.pipeline_mode<synchronous>, transform_indices = @transform_2, window_bounds = array<i64: 1, 512>}, {pipeline_mode = #tpu.pipeline_mode<synchronous>, transform_indices = @transform_3, window_bounds = array<i64: 512, 128>}, {pipeline_mode = #tpu.pipeline_mode<synchronous>, transform_indices = @transform_4, window_bounds = array<i64: 1, 128>}, {transform_indices = @transform_5, window_bounds = array<i64: 8, 128>}]} {
    %c0 = arith.constant 0 : index
    %c0_0 = arith.constant 0 : index
    %0 = vector.load %arg1[%c0, %c0_0] : memref<8x784xf32, #tpu.memory_space<vmem>>, vector<8x784xf32>
    %1 = arith.truncf %0 : vector<8x784xf32> to vector<8x784xbf16>
    %c0_1 = arith.constant 0 : index
    %c0_2 = arith.constant 0 : index
    %2 = vector.load %arg2[%c0_1, %c0_2] : memref<784x512xbf16, #tpu.memory_space<vmem>>, vector<784x512xbf16>
    %cst = arith.constant dense<0.000000e+00> : vector<8x512xf32>
    %3 = tpu.matmul %1, %2, %cst {dimension_numbers = #tpu.dot_dimension_numbers<[1], [0], [0], [1], [0, 0, 1, 1], [], []>} : vector<8x784xbf16>, vector<784x512xbf16>, vector<8x512xf32> -> vector<8x512xf32>
    %c0_3 = arith.constant 0 : index
    %c0_4 = arith.constant 0 : index
    %4 = vector.load %arg3[%c0_3, %c0_4] : memref<1x512xf32, #tpu.memory_space<vmem>>, vector<1x512xf32>
    %5 = vector.broadcast %4 : vector<1x512xf32> to vector<8x512xf32>
    %6 = arith.addf %3, %5 : vector<8x512xf32>
    %cst_5 = arith.constant 0.000000e+00 : f32
    %7 = vector.broadcast %cst_5 : f32 to vector<8x512xf32>
    %8 = arith.maximumf %6, %7 : vector<8x512xf32>
    %9 = arith.truncf %8 : vector<8x512xf32> to vector<8x512xbf16>
    %c0_6 = arith.constant 0 : index
    %c0_7 = arith.constant 0 : index
    %10 = vector.load %arg4[%c0_6, %c0_7] : memref<512x128xbf16, #tpu.memory_space<vmem>>, vector<512x128xbf16>
    %cst_8 = arith.constant dense<0.000000e+00> : vector<8x128xf32>
    %11 = tpu.matmul %9, %10, %cst_8 {dimension_numbers = #tpu.dot_dimension_numbers<[1], [0], [0], [1], [0, 0, 1, 1], [], []>} : vector<8x512xbf16>, vector<512x128xbf16>, vector<8x128xf32> -> vector<8x128xf32>
    %c0_9 = arith.constant 0 : index
    %c0_10 = arith.constant 0 : index
    %12 = vector.load %arg5[%c0_9, %c0_10] : memref<1x128xf32, #tpu.memory_space<vmem>>, vector<1x128xf32>
    %13 = vector.broadcast %12 : vector<1x128xf32> to vector<8x128xf32>
    %14 = arith.addf %11, %13 : vector<8x128xf32>
    %cst_11 = arith.constant 0.000000e+00 : f32
    %15 = vector.broadcast %cst_11 : f32 to vector<8x128xf32>
    %16 = arith.maximumf %14, %15 : vector<8x128xf32>
    %c0_12 = arith.constant 0 : index
    %c0_13 = arith.constant 0 : index
    %17 = vector.load %arg6[%c0_12, %c0_13] : memref<8x128xf32, #tpu.memory_space<vmem>>, vector<8x128xf32>
    tpu.vector_store %arg6[%c0_12, %c0_13], %16 {strides = array<i32>} : memref<8x128xf32, #tpu.memory_space<vmem>>, vector<8x128xf32>,
    return
  }
  func.func @transform_0(%arg0: i32) -> (i32, i32) {
    %c0_i32 = arith.constant 0 : i32
    %c0_i32_0 = arith.constant 0 : i32
    return %arg0, %c0_i32 : i32, i32
  }
  func.func @transform_1(%arg0: i32) -> (i32, i32) {
    %c0_i32 = arith.constant 0 : i32
    %c0_i32_0 = arith.constant 0 : i32
    %c0_i32_1 = arith.constant 0 : i32
    return %c0_i32, %c0_i32_0 : i32, i32
  }
  func.func @transform_2(%arg0: i32) -> (i32, i32) {
    %c0_i32 = arith.constant 0 : i32
    %c0_i32_0 = arith.constant 0 : i32
    %c0_i32_1 = arith.constant 0 : i32
    return %c0_i32, %c0_i32_0 : i32, i32
  }
  func.func @transform_3(%arg0: i32) -> (i32, i32) {
    %c0_i32 = arith.constant 0 : i32
    %c0_i32_0 = arith.constant 0 : i32
    %c0_i32_1 = arith.constant 0 : i32
    return %c0_i32, %c0_i32_0 : i32, i32
  }
  func.func @transform_4(%arg0: i32) -> (i32, i32) {
    %c0_i32 = arith.constant 0 : i32
    %c0_i32_0 = arith.constant 0 : i32
    %c0_i32_1 = arith.constant 0 : i32
    return %c0_i32, %c0_i32_0 : i32, i32
  }
  func.func @transform_5(%arg0: i32) -> (i32, i32) {
    %c0_i32 = arith.constant 0 : i32
    %c0_i32_0 = arith.constant 0 : i32
    return %arg0, %c0_i32 : i32, i32
  }
}

</mosaic_0001>

<bundles_post_ra>
// kernel: _forward.1
= control target key start
LH: loop header
LB: loop body
LE: loop exit
PB: predicated region body
PF: predicated region fallthrough
CT: control target
= control target key end

     0   :  { %10 = vsyncpa [#allocation3], 0  ;;  %s2794_s0 = inlined_call_operand.vmem [shape: f32[8,784], index: 0, kind: input, shape index: {}]   ;;  %s2795_s1 = inlined_call_operand.hbm [shape: bf16[784,512], index: 1, kind: input, shape index: {}]   ;;  %s2796_s2 = inlined_call_operand.vmem [shape: f32[1,512], index: 2, kind: input, shape index: {}]   ;;  %s2797_s3 = inlined_call_operand.vmem [shape: bf16[512,128], index: 3, kind: input, shape index: {}]   ;;  %s2798_s4 = inlined_call_operand.vmem [shape: f32[1,128], index: 4, kind: input, shape index: {}]   ;;  %s2799_s5 = inlined_call_operand.hbm [shape: f32[8,128], index: 5, kind: output, shape index: {}]  }
   0x1   :  { %11 = vsyncpa [#allocation4], 0  ;;  %s2598_s18 = smov [#allocation2]  }
   0x2   :  { %s19_s19 = sshll.u32 %s2598_s18, 4  ;;  %s20_s19 = int_to_ptr.vmem [resolvable:$true] %s19_s19 }
   0x3   :  { %s2562_s20 = scalar_lea.vmem %s20_s19, 25088  ;;  %p2567_p1 = scmp.lt.s32.totalorder %s20_s19, %s20_s19 }
   0x4   :  { %p2563_p0 = scmp.ne.s32.totalorder %s20_s19, %s2562_s20  ;;  %p2568_p2 = scmp.lt.s32.totalorder %s2562_s20, %s2562_s20 }
   0x6   :  { %p2569_p3 = por %p2568_p2, %p2567_p1 }
   0x8   :  { %p2570_p4 = pnand %p2569_p3, %p2563_p0 }
   0xa   :  { %2573 = shalt.err (!%p2570_p4)
}
   0xb   :  { %s2599_s21 = smov 256   ;;  %s2600_s22 = smov 16  }
   0xc   :  { %25 = dma.hbm_to_vmem [thread:$0]  %s2795_s1, 25088, %s20_s19, [#allocation3], %s2599_s21, %s2599_s21, %s2600_s22  }
   0xd   :  { %2594 = dma.done.wait [#allocation3], 25088  }
   0xe   :  { %2595 = vsyncadd [#allocation3], 4294942208  ;;  %v2228_v0 = vld [vmem:[#allocation2 + $0xe4] ss:$16 sps:$4 sm:$0xff]   ;;  %v2232_v2 = vld [vmem:[#allocation2 + $0xe0] ss:$16 sps:$4 sm:$0xff]  }
   0xf   :  { %v2230_v1 = vld [vmem:[#allocation2 + $0x2e4] ss:$16 sps:$4 sm:$0xff]   ;;  %1252 = vmatprep.subr.bf16.mxu0 %v2228_v0  ;;  %v2233_v3 = vld [vmem:[#allocation2 + $0x2e0] ss:$16 sps:$4 sm:$0xff]   ;;  %v37_v46 = vld [vmem:[%s2794_s0 + $0x8] sm:$0xff]  ;;  %vm1248_vm0 = vcmask 130048  }
  0x10   :  { %1293 = vmatprep.subr.bf16.mxu1 %v2230_v1  ;;  %v2234_v4 = vld [vmem:[#allocation2 + $0xc4] ss:$16 sps:$4 sm:$0xff]   ;;  %1253 = vmatpush1.bf16.msra.mxu0 %v2232_v2  ;;  %v2238_v6 = vld [vmem:[#allocation2 + $0xc0] ss:$16 sps:$4 sm:$0xff]   ;;  %v2639_v49 = vpack.c.bf16 %v37_v46, %v37_v46  ;;  %v39_v50 = vld [vmem:[%s2794_s0 + $0x18] sm:$0xff]  ;;  %s2602_s24 = smov [#allocation5]  }
  0x11   :  { %1294 = vmatpush1.bf16.msra.mxu1 %v2233_v3  ;;  %v2236_v5 = vld [vmem:[#allocation2 + $0x2c4] ss:$16 sps:$4 sm:$0xff]   ;;  %1254 = vmatprep.subr.bf16.mxu0 %v2234_v4  ;;  %v2239_v7 = vld [vmem:[#allocation2 + $0x2c0] ss:$16 sps:$4 sm:$0xff]   ;;  %v2644_v52 = vpack.c.bf16 %v39_v50, %v39_v50  ;;  %s1939_s1 = sshll.u32 %s2602_s24, 4  ;;  %s1940_s1 = int_to_ptr.vmem [resolvable:$true] %s1939_s1 }
  0x12   :  { %1295 = vmatprep.subr.bf16.mxu1 %v2236_v5  ;;  %v2240_v8 = vld [vmem:[#allocation2 + $0xa4] ss:$16 sps:$4 sm:$0xff]   ;;  %v2244_v10 = vld [vmem:[#allocation2 + $0xa0] ss:$16 sps:$4 sm:$0xff]   ;;  %1284 = vmatprep.mubr.bf16.mxu0 %v2639_v49  ;;  %s2574_s25 = scalar_lea.vmem %s1940_s1, 128  ;;  %p2579_p6 = scmp.lt.s32.totalorder %s1940_s1, %s1940_s1 }
  0x13   :  { %v2242_v9 = vld [vmem:[#allocation2 + $0x2a4] ss:$16 sps:$4 sm:$0xff]   ;;  %v2245_v11 = vld [vmem:[#allocation2 + $0x2a0] ss:$16 sps:$4 sm:$0xff]   ;;  %1325 = vmatprep.mubr.bf16.mxu1 %v2644_v52  ;;  %p2575_p5 = scmp.ne.s32.totalorder %s1940_s1, %s2574_s25  ;;  %p2580_p7 = scmp.lt.s32.totalorder %s2574_s25, %s2574_s25 }
  0x14   :  { %1255 = vmatpush1.bf16.msra.mxu0 %v2238_v6  ;;  %v2246_v12 = vld [vmem:[#allocation2 + $0x84] ss:$16 sps:$4 sm:$0xff]   ;;  %v2250_v14 = vld [vmem:[#allocation2 + $0x80] ss:$16 sps:$4 sm:$0xff]  }
  0x15   :  { %1296 = vmatpush1.bf16.msra.mxu1 %v2239_v7  ;;  %1256 = vmatprep.subr.bf16.mxu0 %v2240_v8  ;;  %v2248_v13 = vld [vmem:[#allocation2 + $0x284] ss:$16 sps:$4 sm:$0xff]   ;;  %v2251_v15 = vld [vmem:[#allocation2 + $0x280] ss:$16 sps:$4 sm:$0xff]   ;;  %p2581_p8 = por %p2580_p7, %p2579_p6 }
  0x16   :  { %1297 = vmatprep.subr.bf16.mxu1 %v2242_v9  ;;  %v2252_v16 = vld [vmem:[#allocation2 + $0x64] ss:$16 sps:$4 sm:$0xff]   ;;  %v2256_v18 = vld [vmem:[#allocation2 + $0x60] ss:$16 sps:$4 sm:$0xff]  }
  0x17   :  { %v2254_v17 = vld [vmem:[#allocation2 + $0x264] ss:$16 sps:$4 sm:$0xff]   ;;  %v2257_v19 = vld [vmem:[#allocation2 + $0x260] ss:$16 sps:$4 sm:$0xff]   ;;  %p2582_p9 = pnand %p2581_p8, %p2575_p5 }
  0x18   :  { %1257 = vmatpush1.bf16.msra.mxu0 %v2244_v10  ;;  %v2258_v20 = vld [vmem:[#allocation2 + $0x44] ss:$16 sps:$4 sm:$0xff]   ;;  %v2262_v22 = vld [vmem:[#allocation2 + $0x40] ss:$16 sps:$4 sm:$0xff]  }
  0x19   :  { %1298 = vmatpush1.bf16.msra.mxu1 %v2245_v11  ;;  %1258 = vmatprep.subr.bf16.mxu0 %v2246_v12  ;;  %v2260_v21 = vld [vmem:[#allocation2 + $0x244] ss:$16 sps:$4 sm:$0xff]   ;;  %v2263_v23 = vld [vmem:[#allocation2 + $0x240] ss:$16 sps:$4 sm:$0xff]  }
  0x1a   :  { %1299 = vmatprep.subr.bf16.mxu1 %v2248_v13  ;;  %v2264_v24 = vld [vmem:[#allocation2 + $0x24] ss:$16 sps:$4 sm:$0xff]   ;;  %v2268_v26 = vld [vmem:[#allocation2 + $0x20] ss:$16 sps:$4 sm:$0xff]   ;;  %v2335_v13 = vld [vmem:[#allocation2 + $0xec] ss:$16 sps:$4 sm:$0xff]  }
  0x1b   :  { %v2266_v25 = vld [vmem:[#allocation2 + $0x224] ss:$16 sps:$4 sm:$0xff]   ;;  %v2269_v27 = vld [vmem:[#allocation2 + $0x220] ss:$16 sps:$4 sm:$0xff]  }
  0x1c   :  { %1259 = vmatpush1.bf16.msra.mxu0 %v2250_v14  ;;  %v2270_v28 = vld [vmem:[#allocation2 + $0x4] ss:$16 sps:$4 sm:$0xff]   ;;  %v2274_v30 = vld [vmem:[#allocation2] ss:$16 sps:$4 sm:$0xff]  }
  0x1d   :  { %1300 = vmatpush1.bf16.msra.mxu1 %v2251_v15  ;;  %1260 = vmatprep.subr.bf16.mxu0 %v2252_v16  ;;  %v2272_v29 = vld [vmem:[#allocation2 + $0x204] ss:$16 sps:$4 sm:$0xff]   ;;  %v2275_v31 = vld [vmem:[#allocation2 + $0x200] ss:$16 sps:$4 sm:$0xff]   ;;  %v2601_v16 = vmov 0  }
  0x1e   :  { %1301 = vmatprep.subr.bf16.mxu1 %v2254_v17  ;;  %v2276_v32 = vld [vmem:[#allocation2 + $0x1e4] ss:$16 sps:$4 sm:$0xff]   ;;  %v2280_v34 = vld [vmem:[#allocation2 + $0x1e0] ss:$16 sps:$4 sm:$0xff]  }
  0x1f   :  { %v2278_v33 = vld [vmem:[#allocation2 + $0x3e4] ss:$16 sps:$4 sm:$0xff]   ;;  %v2281_v35 = vld [vmem:[#allocation2 + $0x3e0] ss:$16 sps:$4 sm:$0xff]  }
  0x20   :  { %1261 = vmatpush1.bf16.msra.mxu0 %v2256_v18  ;;  %v2282_v36 = vld [vmem:[#allocation2 + $0x1c4] ss:$16 sps:$4 sm:$0xff]   ;;  %v2286_v38 = vld [vmem:[#allocation2 + $0x1c0] ss:$16 sps:$4 sm:$0xff]   ;;  %v2333_v18 = vld [vmem:[#allocation2 + $0xe8] ss:$16 sps:$4 sm:$0xff]  }
  0x21   :  { %1302 = vmatpush1.bf16.msra.mxu1 %v2257_v19  ;;  %1262 = vmatprep.subr.bf16.mxu0 %v2258_v20  ;;  %v2284_v37 = vld [vmem:[#allocation2 + $0x3c4] ss:$16 sps:$4 sm:$0xff]   ;;  %v2287_v39 = vld [vmem:[#allocation2 + $0x3c0] ss:$16 sps:$4 sm:$0xff]  }
  0x22   :  { %1303 = vmatprep.subr.bf16.mxu1 %v2260_v21  ;;  %v2288_v40 = vld [vmem:[#allocation2 + $0x1a4] ss:$16 sps:$4 sm:$0xff]   ;;  %v2292_v42 = vld [vmem:[#allocation2 + $0x1a0] ss:$16 sps:$4 sm:$0xff]   ;;  %v2341_v21 = vld [vmem:[#allocation2 + $0xcc] ss:$16 sps:$4 sm:$0xff]  }
  0x23   :  { %v2290_v41 = vld [vmem:[#allocation2 + $0x3a4] ss:$16 sps:$4 sm:$0xff]   ;;  %v2293_v43 = vld [vmem:[#allocation2 + $0x3a0] ss:$16 sps:$4 sm:$0xff]  }
  0x24   :  { %1263 = vmatpush1.bf16.msra.mxu0 %v2262_v22  ;;  %v2294_v44 = vld [vmem:[#allocation2 + $0x184] ss:$16 sps:$4 sm:$0xff]   ;;  %v2298_v47 = vld [vmem:[#allocation2 + $0x180] ss:$16 sps:$4 sm:$0xff]  }
  0x25   :  { %1304 = vmatpush1.bf16.msra.mxu1 %v2263_v23  ;;  %1264 = vmatprep.subr.bf16.mxu0 %v2264_v24  ;;  %v2296_v45 = vld [vmem:[#allocation2 + $0x384] ss:$16 sps:$4 sm:$0xff]   ;;  %v2299_v48 = vld [vmem:[#allocation2 + $0x380] ss:$16 sps:$4 sm:$0xff]   ;;  %v2339_v23 = vld [vmem:[#allocation2 + $0xc8] ss:$16 sps:$4 sm:$0xff]  }
  0x26   :  { %1305 = vmatprep.subr.bf16.mxu1 %v2266_v25  ;;  %v2300_v51 = vld [vmem:[#allocation2 + $0x164] ss:$16 sps:$4 sm:$0xff]   ;;  %v2304_v54 = vld [vmem:[#allocation2 + $0x160] ss:$16 sps:$4 sm:$0xff]   ;;  %v2347_v25 = vld [vmem:[#allocation2 + $0xac] ss:$16 sps:$4 sm:$0xff]  }
  0x27   :  { %v2302_v53 = vld [vmem:[#allocation2 + $0x364] ss:$16 sps:$4 sm:$0xff]   ;;  %v2305_v55 = vld [vmem:[#allocation2 + $0x360] ss:$16 sps:$4 sm:$0xff]  }
  0x28   :  { %1265 = vmatpush1.bf16.msra.mxu0 %v2268_v26  ;;  %v2306_v56 = vld [vmem:[#allocation2 + $0x144] ss:$16 sps:$4 sm:$0xff]   ;;  %v2310_v58 = vld [vmem:[#allocation2 + $0x140] ss:$16 sps:$4 sm:$0xff]  }
  0x29   :  { %1306 = vmatpush1.bf16.msra.mxu1 %v2269_v27  ;;  %1266 = vmatprep.subr.bf16.mxu0 %v2270_v28  ;;  %v2308_v57 = vld [vmem:[#allocation2 + $0x344] ss:$16 sps:$4 sm:$0xff]   ;;  %v2311_v59 = vld [vmem:[#allocation2 + $0x340] ss:$16 sps:$4 sm:$0xff]   ;;  %v2345_v27 = vld [vmem:[#allocation2 + $0xa8] ss:$16 sps:$4 sm:$0xff]  }
  0x2a   :  { %1307 = vmatprep.subr.bf16.mxu1 %v2272_v29  ;;  %v2312_v60 = vld [vmem:[#allocation2 + $0x124] ss:$16 sps:$4 sm:$0xff]   ;;  %v2316_v62 = vld [vmem:[#allocation2 + $0x120] ss:$16 sps:$4 sm:$0xff]   ;;  %v2353_v29 = vld [vmem:[#allocation2 + $0x8c] ss:$16 sps:$4 sm:$0xff]  }
  0x2b   :  { %v2314_v61 = vld [vmem:[#allocation2 + $0x324] ss:$16 sps:$4 sm:$0xff]   ;;  %v2317_v63 = vld [vmem:[#allocation2 + $0x320] ss:$16 sps:$4 sm:$0xff]  }
  0x2c   :  { %1267 = vmatpush1.bf16.msra.mxu0 %v2274_v30  ;;  %v2318_v0 = vld [vmem:[#allocation2 + $0x104] ss:$16 sps:$4 sm:$0xff]   ;;  %v2322_v2 = vld [vmem:[#allocation2 + $0x100] ss:$16 sps:$4 sm:$0xff]  }
  0x2d   :  { %1308 = vmatpush1.bf16.msra.mxu1 %v2275_v31  ;;  %1268 = vmatprep.subr.bf16.mxu0 %v2276_v32  ;;  %v2320_v1 = vld [vmem:[#allocation2 + $0x304] ss:$16 sps:$4 sm:$0xff]   ;;  %v2323_v3 = vld [vmem:[#allocation2 + $0x300] ss:$16 sps:$4 sm:$0xff]   ;;  %v2351_v31 = vld [vmem:[#allocation2 + $0x88] ss:$16 sps:$4 sm:$0xff]  }
  0x2e   :  { %1309 = vmatprep.subr.bf16.mxu1 %v2278_v33  ;;  %v36_v4 = vld [vmem:[%s2794_s0] sm:$0xff]  ;;  %v38_v5 = vld [vmem:[%s2794_s0 + $0x10] sm:$0xff]  ;;  %v2359_v33 = vld [vmem:[#allocation2 + $0x6c] ss:$16 sps:$4 sm:$0xff]  }
  0x2f   :  { %v2326_v6 = vld [vmem:[#allocation2 + $0x4e4] ss:$16 sps:$4 sm:$0xff]   ;;  %v2654_v8 = vpack.c.bf16 %v36_v4, %v36_v4  ;;  %v2656_v9 = vpack.c.bf16 %v38_v5, %v38_v5  ;;  %v2324_v10 = vld [vmem:[#allocation2 + $0x4e0] ss:$16 sps:$4 sm:$0xff]   ;;  %v2407_v4 = vld [vmem:[#allocation2 + $0x16c] ss:$16 sps:$4 sm:$0xff]  }
  0x30   :  { %1269 = vmatpush2.bf16.msra.mxu0 %v2280_v34  ;;  %v2329_v7 = vld [vmem:[#allocation2 + $0x604] ss:$16 sps:$4 sm:$0xff]   ;;  %v2327_v11 = vld [vmem:[#allocation2 + $0x600] ss:$16 sps:$4 sm:$0xff]  }
  0x31   :  { %1310 = vmatpush2.bf16.msra.mxu1 %v2281_v35  ;;  %1270 = vmatprep.subr.bf16.mxu0 %v2282_v36  ;;  %v2332_v12 = vld [vmem:[#allocation2 + $0x4c4] ss:$16 sps:$4 sm:$0xff]   ;;  %v2330_v14 = vld [vmem:[#allocation2 + $0x4c0] ss:$16 sps:$4 sm:$0xff]   ;;  %v41_v35 = vld [vmem:[%s2794_s0 + $0x28] sm:$0xff] }
  0x32   :  { %1311 = vmatprep.subr.bf16.mxu1 %v2284_v37  ;;  %v42_v15 = vld [vmem:[%s2794_s0 + $0x30] sm:$0xff]  ;;  %v2672_v36 = vpack.c.bf16 %v41_v35, %v41_v35  ;;  %v2357_v37 = vld [vmem:[#allocation2 + $0x68] ss:$16 sps:$4 sm:$0xff]   ;;  %v2446_v35 = vld [vmem:[#allocation2 + $0x26c] ss:$16 sps:$4 sm:$0xff]  }
  0x33   :  { %v2338_v17 = vld [vmem:[#allocation2 + $0x4a4] ss:$16 sps:$4 sm:$0xff]   ;;  %v2664_v19 = vpack.c.bf16 %v42_v15, %v42_v15  ;;  %v2336_v20 = vld [vmem:[#allocation2 + $0x4a0] ss:$16 sps:$4 sm:$0xff]  }
  0x34   :  { %1271 = vmatpush2.bf16.msra.mxu0 %v2286_v38  ;;  %v2344_v22 = vld [vmem:[#allocation2 + $0x484] ss:$16 sps:$4 sm:$0xff]   ;;  %v2342_v24 = vld [vmem:[#allocation2 + $0x480] ss:$16 sps:$4 sm:$0xff]  }
  0x35   :  { %1312 = vmatpush2.bf16.msra.mxu1 %v2287_v39  ;;  %1272 = vmatprep.subr.bf16.mxu0 %v2288_v40  ;;  %v2350_v26 = vld [vmem:[#allocation2 + $0x464] ss:$16 sps:$4 sm:$0xff]   ;;  %v2348_v28 = vld [vmem:[#allocation2 + $0x460] ss:$16 sps:$4 sm:$0xff]   ;;  %v2365_v39 = vld [vmem:[#allocation2 + $0x4c] ss:$16 sps:$4 sm:$0xff]  }
  0x36   :  { %1313 = vmatprep.subr.bf16.mxu1 %v2290_v41  ;;  %v2356_v30 = vld [vmem:[#allocation2 + $0x444] ss:$16 sps:$4 sm:$0xff]   ;;  %v2354_v32 = vld [vmem:[#allocation2 + $0x440] ss:$16 sps:$4 sm:$0xff]   ;;  %v2363_v41 = vld [vmem:[#allocation2 + $0x48] ss:$16 sps:$4 sm:$0xff]  }
  0x37   :  { %v2362_v34 = vld [vmem:[#allocation2 + $0x424] ss:$16 sps:$4 sm:$0xff]   ;;  %v2360_v38 = vld [vmem:[#allocation2 + $0x420] ss:$16 sps:$4 sm:$0xff]  }
  0x38   :  { %1273 = vmatpush2.bf16.msra.mxu0 %v2292_v42  ;;  %v2368_v40 = vld [vmem:[#allocation2 + $0x404] ss:$16 sps:$4 sm:$0xff]   ;;  %v2366_v42 = vld [vmem:[#allocation2 + $0x400] ss:$16 sps:$4 sm:$0xff]  }
  0x39   :  { %1314 = vmatpush2.bf16.msra.mxu1 %v2293_v43  ;;  %1274 = vmatprep.subr.bf16.mxu0 %v2294_v44  ;;  %v2371_v43 = vld [vmem:[#allocation2 + $0x2c] ss:$16 sps:$4 sm:$0xff]   ;;  %v2374_v44 = vld [vmem:[#allocation2 + $0x5e4] ss:$16 sps:$4 sm:$0xff]   ;;  %v2372_v46 = vld [vmem:[#allocation2 + $0x5e0] ss:$16 sps:$4 sm:$0xff]  }
  0x3a   :  { %1315 = vmatprep.subr.bf16.mxu1 %v2296_v45  ;;  %v2369_v45 = vld [vmem:[#allocation2 + $0x28] ss:$16 sps:$4 sm:$0xff]   ;;  %v2378_v50 = vld [vmem:[#allocation2 + $0x5c0] ss:$16 sps:$4 sm:$0xff]   ;;  %v2410_v5 = vld [vmem:[#allocation2 + $0x524] ss:$16 sps:$4 sm:$0xff]  }
  0x3b   :  { %v40_v15 = vld [vmem:[%s2794_s0 + $0x20] sm:$0xff] }
  0x3c   :  { %1275 = vmatpush2.bf16.msra.mxu0 %v2298_v47  ;;  %v2377_v47 = vld [vmem:[#allocation2 + $0xc] ss:$16 sps:$4 sm:$0xff]  }
  0x3d   :  { %1316 = vmatpush2.bf16.msra.mxu1 %v2299_v48  ;;  %1276 = vmatprep.subr.bf16.mxu0 %v2300_v51  ;;  %v2380_v48 = vld [vmem:[#allocation2 + $0x5c4] ss:$16 sps:$4 sm:$0xff]   ;;  %v2383_v51 = vld [vmem:[#allocation2 + $0x1ec] ss:$16 sps:$4 sm:$0xff]  }
  0x3e   :  { %1317 = vmatprep.subr.bf16.mxu1 %v2302_v53  ;;  %v2386_v53 = vld [vmem:[#allocation2 + $0x5a4] ss:$16 sps:$4 sm:$0xff]  }
  0x40   :  { %1277 = vmatpush2.bf16.msra.mxu0 %v2304_v54  ;;  %v2381_v54 = vld [vmem:[#allocation2 + $0x1e8] ss:$16 sps:$4 sm:$0xff]  }
  0x41   :  { %1318 = vmatpush2.bf16.msra.mxu1 %v2305_v55  ;;  %1278 = vmatprep.subr.bf16.mxu0 %v2306_v56  ;;  %v2384_v55 = vld [vmem:[#allocation2 + $0x5a0] ss:$16 sps:$4 sm:$0xff]   ;;  %v2389_v56 = vld [vmem:[#allocation2 + $0x1cc] ss:$16 sps:$4 sm:$0xff]  }
  0x42   :  { %1319 = vmatprep.subr.bf16.mxu1 %v2308_v57  ;;  %v2392_v57 = vld [vmem:[#allocation2 + $0x584] ss:$16 sps:$4 sm:$0xff]  }
  0x44   :  { %1279 = vmatpush2.bf16.msra.mxu0 %v2310_v58  ;;  %v2387_v58 = vld [vmem:[#allocation2 + $0x1c8] ss:$16 sps:$4 sm:$0xff]  }
  0x45   :  { %1320 = vmatpush2.bf16.msra.mxu1 %v2311_v59  ;;  %1280 = vmatprep.subr.bf16.mxu0 %v2312_v60  ;;  %v2390_v59 = vld [vmem:[#allocation2 + $0x580] ss:$16 sps:$4 sm:$0xff]   ;;  %v2395_v60 = vld [vmem:[#allocation2 + $0x1ac] ss:$16 sps:$4 sm:$0xff]  }
  0x46   :  { %1321 = vmatprep.subr.bf16.mxu1 %v2314_v61  ;;  %v2398_v61 = vld [vmem:[#allocation2 + $0x564] ss:$16 sps:$4 sm:$0xff]  }
  0x48   :  { %1281 = vmatpush2.bf16.msra.mxu0 %v2316_v62  ;;  %v2393_v62 = vld [vmem:[#allocation2 + $0x1a8] ss:$16 sps:$4 sm:$0xff]  }
  0x49   :  { %1322 = vmatpush2.bf16.msra.mxu1 %v2317_v63  ;;  %1282 = vmatprep.subr.bf16.mxu0 %v2318_v0  ;;  %v2396_v63 = vld [vmem:[#allocation2 + $0x560] ss:$16 sps:$4 sm:$0xff]   ;;  %v2401_v0 = vld [vmem:[#allocation2 + $0x18c] ss:$16 sps:$4 sm:$0xff]  }
  0x4a   :  { %1323 = vmatprep.subr.bf16.mxu1 %v2320_v1  ;;  %v2404_v1 = vld [vmem:[#allocation2 + $0x544] ss:$16 sps:$4 sm:$0xff]  }
  0x4c   :  { %1283 = vmatpush2.bf16.msra.mxu0 %v2322_v2  ;;  %v2399_v2 = vld [vmem:[#allocation2 + $0x188] ss:$16 sps:$4 sm:$0xff]  }
  0x4d   :  { %1324 = vmatpush2.bf16.msra.mxu1 %v2323_v3  ;;  %1334 = vmatprep.subr.bf16.mxu0 %v2326_v6  ;;  %v2402_v3 = vld [vmem:[#allocation2 + $0x540] ss:$16 sps:$4 sm:$0xff]   ;;  %v2405_v6 = vld [vmem:[#allocation2 + $0x168] ss:$16 sps:$4 sm:$0xff]  }
  0x4e   :  { %1389 = vmatprep.subr.bf16.mxu1 %v2329_v7  ;;  %v2408_v7 = vld [vmem:[#allocation2 + $0x520] ss:$16 sps:$4 sm:$0xff]  }
  0x4f   :  { %1285 = vmatmul.mubr.bf16.vlgmr.msra.gmra.mxu0 %v2654_v8 }
  0x50   :  { %1326 = vmatmul.mubr.bf16.vlgmr.msra.gmra.mxu1 %v2656_v9  ;;  %1335 = vmatpush1.bf16.msra.mxu0 %v2324_v10  ;;  %v2413_v10 = vld [vmem:[#allocation2 + $0x14c] ss:$16 sps:$4 sm:$0xff]  }
  0x51   :  { %1390 = vmatpush1.bf16.msra.mxu1 %v2327_v11  ;;  %1336 = vmatprep.subr.bf16.mxu0 %v2332_v12  ;;  %v2416_v11 = vld [vmem:[#allocation2 + $0x504] ss:$16 sps:$4 sm:$0xff]   ;;  %v2411_v12 = vld [vmem:[#allocation2 + $0x148] ss:$16 sps:$4 sm:$0xff]  }
  0x52   :  { %1407 = vmatprep.mubr.bf16.mxu1 %v2601_v16  ;;  %1416 = vmatprep.subr.bf16.mxu1 %v2335_v13  ;;  %v2414_v13 = vld [vmem:[#allocation2 + $0x500] ss:$16 sps:$4 sm:$0xff]  }
  0x53   :  { %1366 = vmatprep.mubr.bf16.mxu0 %v2672_v36 }
  0x54   :  { %1337 = vmatpush1.bf16.msra.mxu0 %v2330_v14  ;;  %v2419_v14 = vld [vmem:[#allocation2 + $0x12c] ss:$16 sps:$4 sm:$0xff]  }
  0x55   :  { %1338 = vmatprep.subr.bf16.mxu0 %v2338_v17  ;;  %v2422_v17 = vld [vmem:[#allocation2 + $0x2ec] ss:$16 sps:$4 sm:$0xff]  }
  0x58   :  { %2144 = vmatmul.mubr.msk.bf16.vlgmr.msra.gmra.mxu1 %vm1248_vm0, %v2664_v19  ;;  %1339 = vmatpush1.bf16.msra.mxu0 %v2336_v20  ;;  %v2678_v20 = vpack.c.bf16 %v40_v15, %v40_v15  ;;  %v2509_v15 = vld [vmem:[#allocation2 + $0x54c] ss:$16 sps:$4 sm:$0xff]  }
  0x59   :  { %1417 = vmatpush1.bf16.msra.mxu1 %v2333_v18  ;;  %1340 = vmatprep.subr.bf16.mxu0 %v2344_v22  ;;  %v2417_v18 = vld [vmem:[#allocation2 + $0x128] ss:$16 sps:$4 sm:$0xff]   ;;  %v2425_v22 = vld [vmem:[#allocation2 + $0x10c] ss:$16 sps:$4 sm:$0xff]  }
  0x5a   :  { %1418 = vmatprep.subr.bf16.mxu1 %v2341_v21  ;;  %1448 = vmatprep.mubr.bf16.mxu1 %v2639_v49  ;;  %v2375_v49 = vld [vmem:[#allocation2 + $0x8] ss:$16 sps:$4 sm:$0xff]  }
  0x5b   :  { %v2420_v21 = vld [vmem:[#allocation2 + $0x2e8] ss:$16 sps:$4 sm:$0xff]  }
  0x5c   :  { %1341 = vmatpush1.bf16.msra.mxu0 %v2342_v24  ;;  %v2423_v24 = vld [vmem:[#allocation2 + $0x108] ss:$16 sps:$4 sm:$0xff]  }
  0x5d   :  { %1419 = vmatpush1.bf16.msra.mxu1 %v2339_v23  ;;  %1342 = vmatprep.subr.bf16.mxu0 %v2350_v26  ;;  %v2428_v23 = vld [vmem:[#allocation2 + $0x2cc] ss:$16 sps:$4 sm:$0xff]  }
  0x5e   :  { %1420 = vmatprep.subr.bf16.mxu1 %v2347_v25  ;;  %v2426_v25 = vld [vmem:[#allocation2 + $0x2c8] ss:$16 sps:$4 sm:$0xff]   ;;  %v2431_v26 = vld [vmem:[#allocation2 + $0x4ec] ss:$16 sps:$4 sm:$0xff]  }
  0x60   :  { %1343 = vmatpush1.bf16.msra.mxu0 %v2348_v28  ;;  %v2429_v28 = vld [vmem:[#allocation2 + $0x4e8] ss:$16 sps:$4 sm:$0xff]  }
  0x61   :  { %1421 = vmatpush1.bf16.msra.mxu1 %v2345_v27  ;;  %1344 = vmatprep.subr.bf16.mxu0 %v2356_v30  ;;  %v2434_v27 = vld [vmem:[#allocation2 + $0x2ac] ss:$16 sps:$4 sm:$0xff]  }
  0x62   :  { %1422 = vmatprep.subr.bf16.mxu1 %v2353_v29  ;;  %v2432_v29 = vld [vmem:[#allocation2 + $0x2a8] ss:$16 sps:$4 sm:$0xff]   ;;  %v2437_v30 = vld [vmem:[#allocation2 + $0x4cc] ss:$16 sps:$4 sm:$0xff]  }
  0x64   :  { %1345 = vmatpush1.bf16.msra.mxu0 %v2354_v32  ;;  %v2435_v32 = vld [vmem:[#allocation2 + $0x4c8] ss:$16 sps:$4 sm:$0xff]  }
  0x65   :  { %1423 = vmatpush1.bf16.msra.mxu1 %v2351_v31  ;;  %1346 = vmatprep.subr.bf16.mxu0 %v2362_v34  ;;  %v2440_v31 = vld [vmem:[#allocation2 + $0x28c] ss:$16 sps:$4 sm:$0xff]  }
  0x66   :  { %1424 = vmatprep.subr.bf16.mxu1 %v2359_v33  ;;  %v2438_v33 = vld [vmem:[#allocation2 + $0x288] ss:$16 sps:$4 sm:$0xff]   ;;  %v2443_v34 = vld [vmem:[#allocation2 + $0x4ac] ss:$16 sps:$4 sm:$0xff]  }
  0x68   :  { %1347 = vmatpush1.bf16.msra.mxu0 %v2360_v38  ;;  %v2444_v38 = vld [vmem:[#allocation2 + $0x268] ss:$16 sps:$4 sm:$0xff]  }
  0x69   :  { %1425 = vmatpush1.bf16.msra.mxu1 %v2357_v37  ;;  %1348 = vmatprep.subr.bf16.mxu0 %v2368_v40  ;;  %v2441_v37 = vld [vmem:[#allocation2 + $0x4a8] ss:$16 sps:$4 sm:$0xff]  }
  0x6a   :  { %1426 = vmatprep.subr.bf16.mxu1 %v2365_v39  ;;  %v2452_v39 = vld [vmem:[#allocation2 + $0x24c] ss:$16 sps:$4 sm:$0xff]   ;;  %v2447_v40 = vld [vmem:[#allocation2 + $0x488] ss:$16 sps:$4 sm:$0xff]  }
  0x6c   :  { %1349 = vmatpush1.bf16.msra.mxu0 %v2366_v42  ;;  %v2455_v42 = vld [vmem:[#allocation2 + $0x46c] ss:$16 sps:$4 sm:$0xff]  }
  0x6d   :  { %1427 = vmatpush1.bf16.msra.mxu1 %v2363_v41  ;;  %1350 = vmatprep.subr.bf16.mxu0 %v2374_v44  ;;  %v2450_v41 = vld [vmem:[#allocation2 + $0x248] ss:$16 sps:$4 sm:$0xff]  }
  0x6e   :  { %1428 = vmatprep.subr.bf16.mxu1 %v2371_v43  ;;  %v2453_v43 = vld [vmem:[#allocation2 + $0x468] ss:$16 sps:$4 sm:$0xff]  }
  0x6f   :  { %v2456_v44 = vld [vmem:[#allocation2 + $0x228] ss:$16 sps:$4 sm:$0xff]  }
  0x70   :  { %1351 = vmatpush2.bf16.msra.mxu0 %v2372_v46  ;;  %v2464_v46 = vld [vmem:[#allocation2 + $0x20c] ss:$16 sps:$4 sm:$0xff]  }
  0x71   :  { %1429 = vmatpush1.bf16.msra.mxu1 %v2369_v45  ;;  %1352 = vmatprep.subr.bf16.mxu0 %v2380_v48  ;;  %v2461_v45 = vld [vmem:[#allocation2 + $0x44c] ss:$16 sps:$4 sm:$0xff]  }
  0x72   :  { %1430 = vmatprep.subr.bf16.mxu1 %v2377_v47  ;;  %v2462_v47 = vld [vmem:[#allocation2 + $0x208] ss:$16 sps:$4 sm:$0xff]   ;;  %v2467_v48 = vld [vmem:[#allocation2 + $0x42c] ss:$16 sps:$4 sm:$0xff]  }
  0x74   :  { %1353 = vmatpush2.bf16.msra.mxu0 %v2378_v50  ;;  %v2465_v50 = vld [vmem:[#allocation2 + $0x428] ss:$16 sps:$4 sm:$0xff]  }
  0x75   :  { %1431 = vmatpush1.bf16.msra.mxu1 %v2375_v49  ;;  %1354 = vmatprep.subr.bf16.mxu0 %v2386_v53  ;;  %v2470_v49 = vld [vmem:[#allocation2 + $0x3ec] ss:$16 sps:$4 sm:$0xff]  }
  0x76   :  { %1432 = vmatprep.subr.bf16.mxu1 %v2383_v51  ;;  %v2468_v51 = vld [vmem:[#allocation2 + $0x3e8] ss:$16 sps:$4 sm:$0xff]   ;;  %v2473_v53 = vld [vmem:[#allocation2 + $0x40c] ss:$16 sps:$4 sm:$0xff]  }
  0x78   :  { %1355 = vmatpush2.bf16.msra.mxu0 %v2384_v55  ;;  %v2471_v55 = vld [vmem:[#allocation2 + $0x408] ss:$16 sps:$4 sm:$0xff]  }
  0x79   :  { %1433 = vmatpush2.bf16.msra.mxu1 %v2381_v54  ;;  %1356 = vmatprep.subr.bf16.mxu0 %v2392_v57  ;;  %v2476_v54 = vld [vmem:[#allocation2 + $0x3cc] ss:$16 sps:$4 sm:$0xff]  }
  0x7a   :  { %1434 = vmatprep.subr.bf16.mxu1 %v2389_v56  ;;  %v2474_v56 = vld [vmem:[#allocation2 + $0x3c8] ss:$16 sps:$4 sm:$0xff]   ;;  %v2479_v57 = vld [vmem:[#allocation2 + $0x5ec] ss:$16 sps:$4 sm:$0xff]  }
  0x7c   :  { %1357 = vmatpush2.bf16.msra.mxu0 %v2390_v59  ;;  %v2477_v59 = vld [vmem:[#allocation2 + $0x5e8] ss:$16 sps:$4 sm:$0xff]  }
  0x7d   :  { %1435 = vmatpush2.bf16.msra.mxu1 %v2387_v58  ;;  %1358 = vmatprep.subr.bf16.mxu0 %v2398_v61  ;;  %v2482_v58 = vld [vmem:[#allocation2 + $0x3ac] ss:$16 sps:$4 sm:$0xff]  }
  0x7e   :  { %1436 = vmatprep.subr.bf16.mxu1 %v2395_v60  ;;  %v2480_v60 = vld [vmem:[#allocation2 + $0x3a8] ss:$16 sps:$4 sm:$0xff]   ;;  %v2485_v61 = vld [vmem:[#allocation2 + $0x5cc] ss:$16 sps:$4 sm:$0xff]  }
  0x80   :  { %1359 = vmatpush2.bf16.msra.mxu0 %v2396_v63  ;;  %v2483_v63 = vld [vmem:[#allocation2 + $0x5c8] ss:$16 sps:$4 sm:$0xff]  }
  0x81   :  { %1437 = vmatpush2.bf16.msra.mxu1 %v2393_v62  ;;  %1360 = vmatprep.subr.bf16.mxu0 %v2404_v1  ;;  %v2488_v62 = vld [vmem:[#allocation2 + $0x38c] ss:$16 sps:$4 sm:$0xff]  }
  0x82   :  { %1438 = vmatprep.subr.bf16.mxu1 %v2401_v0  ;;  %v2486_v0 = vld [vmem:[#allocation2 + $0x388] ss:$16 sps:$4 sm:$0xff]   ;;  %v2491_v1 = vld [vmem:[#allocation2 + $0x5ac] ss:$16 sps:$4 sm:$0xff]  }
  0x84   :  { %1361 = vmatpush2.bf16.msra.mxu0 %v2402_v3  ;;  %v2489_v3 = vld [vmem:[#allocation2 + $0x5a8] ss:$16 sps:$4 sm:$0xff]  }
  0x85   :  { %1439 = vmatpush2.bf16.msra.mxu1 %v2399_v2  ;;  %1362 = vmatprep.subr.bf16.mxu0 %v2410_v5  ;;  %v2494_v2 = vld [vmem:[#allocation2 + $0x36c] ss:$16 sps:$4 sm:$0xff]  }
  0x86   :  { %1440 = vmatprep.subr.bf16.mxu1 %v2407_v4  ;;  %v2492_v4 = vld [vmem:[#allocation2 + $0x368] ss:$16 sps:$4 sm:$0xff]   ;;  %v2497_v5 = vld [vmem:[#allocation2 + $0x58c] ss:$16 sps:$4 sm:$0xff]  }
  0x88   :  { %1363 = vmatpush2.bf16.msra.mxu0 %v2408_v7  ;;  %v2495_v7 = vld [vmem:[#allocation2 + $0x588] ss:$16 sps:$4 sm:$0xff]  }
  0x89   :  { %1441 = vmatpush2.bf16.msra.mxu1 %v2405_v6  ;;  %1364 = vmatprep.subr.bf16.mxu0 %v2416_v11  ;;  %v2500_v6 = vld [vmem:[#allocation2 + $0x34c] ss:$16 sps:$4 sm:$0xff]  }
  0x8a   :  { %1442 = vmatprep.subr.bf16.mxu1 %v2413_v10  ;;  %v2498_v10 = vld [vmem:[#allocation2 + $0x348] ss:$16 sps:$4 sm:$0xff]   ;;  %v2503_v11 = vld [vmem:[#allocation2 + $0x56c] ss:$16 sps:$4 sm:$0xff]  }
  0x8c   :  { %1365 = vmatpush2.bf16.msra.mxu0 %v2414_v13  ;;  %v2501_v13 = vld [vmem:[#allocation2 + $0x568] ss:$16 sps:$4 sm:$0xff]  }
  0x8d   :  { %1443 = vmatpush2.bf16.msra.mxu1 %v2411_v12  ;;  %1457 = vmatprep.subr.bf16.mxu0 %v2422_v17  ;;  %v2506_v12 = vld [vmem:[#allocation2 + $0x32c] ss:$16 sps:$4 sm:$0xff]  }
  0x8e   :  { %1444 = vmatprep.subr.bf16.mxu1 %v2419_v14  ;;  %v2504_v14 = vld [vmem:[#allocation2 + $0x328] ss:$16 sps:$4 sm:$0xff]   ;;  %v2512_v17 = vld [vmem:[#allocation2 + $0x30c] ss:$16 sps:$4 sm:$0xff]  }
  0x8f   :  { %1367 = vmatmul.mubr.bf16.vlgmr.msra.gmra.mxu0 %v2678_v20 }
  0x90   :  { %1458 = vmatpush1.bf16.msra.mxu0 %v2420_v21  ;;  %1489 = vmatprep.mubr.bf16.mxu0 %v2644_v52  ;;  %v2449_v52 = vld [vmem:[#allocation2 + $0x48c] ss:$16 sps:$4 sm:$0xff]   ;;  %v2510_v21 = vld [vmem:[#allocation2 + $0x308] ss:$16 sps:$4 sm:$0xff]  }
  0x91   :  { %1445 = vmatpush2.bf16.msra.mxu1 %v2417_v18  ;;  %1459 = vmatprep.subr.bf16.mxu0 %v2428_v23  ;;  %v2507_v18 = vld [vmem:[#allocation2 + $0x548] ss:$16 sps:$4 sm:$0xff]   ;;  %v2518_v23 = vld [vmem:[#allocation2 + $0x60c] ss:$16 sps:$4 sm:$0xff]  }
  0x92   :  { %1446 = vmatprep.subr.bf16.mxu1 %v2425_v22  ;;  %v2515_v22 = vld [vmem:[#allocation2 + $0x52c] ss:$16 sps:$4 sm:$0xff]  }
  0x94   :  { %1460 = vmatpush1.bf16.msra.mxu0 %v2426_v25  ;;  %v2516_v25 = vld [vmem:[#allocation2 + $0x608] ss:$16 sps:$4 sm:$0xff]  }
  0x95   :  { %1447 = vmatpush2.bf16.msra.mxu1 %v2423_v24  ;;  %1461 = vmatprep.subr.bf16.mxu0 %v2434_v27  ;;  %v2513_v24 = vld [vmem:[#allocation2 + $0x528] ss:$16 sps:$4 sm:$0xff]  }
  0x96   :  { %1498 = vmatprep.subr.bf16.mxu1 %v2431_v26  ;;  %v2521_v26 = vld [vmem:[#allocation2 + $0x50c] ss:$16 sps:$4 sm:$0xff]  }
  0x97   :  { %v2522_v27 = vld [vmem:[%s2797_s3 + $0x78] sm:$0xff]  }
  0x98   :  { %1449 = vmatmul.mubr.bf16.vlgmr.msra.gmra.mxu1 %v2654_v8  ;;  %1462 = vmatpush1.bf16.msra.mxu0 %v2432_v29  ;;  %v2458_v8 = vld [vmem:[#allocation2 + $0x22c] ss:$16 sps:$4 sm:$0xff]  }
  0x99   :  { %1499 = vmatpush1.bf16.msra.mxu1 %v2429_v28  ;;  %1463 = vmatprep.subr.bf16.mxu0 %v2440_v31  ;;  %v2519_v28 = vld [vmem:[#allocation2 + $0x508] ss:$16 sps:$4 sm:$0xff]  }
  0x9a   :  { %1500 = vmatprep.subr.bf16.mxu1 %v2437_v30  ;;  %1530 = vmatprep.mubr.bf16.mxu1 %v2672_v36  ;;  %v2459_v36 = vld [vmem:[#allocation2 + $0x448] ss:$16 sps:$4 sm:$0xff]   ;;  %v2524_v30 = vld [vmem:[%s2797_s3 + $0x70] sm:$0xff]  }
  0x9b   :  { %v2523_v29 = vld [vmem:[%s2797_s3 + $0x38] sm:$0xff]   ;;  %v2527_v31 = vld [vmem:[%s2797_s3 + $0x28] sm:$0xff]  }
  0x9c   :  { %1464 = vmatpush1.bf16.msra.mxu0 %v2438_v33  ;;  %v2540_v33 = vld [vmem:[%s2797_s3 + $0xf0] sm:$0xff]  }
  0x9d   :  { %1501 = vmatpush1.bf16.msra.mxu1 %v2435_v32  ;;  %1465 = vmatprep.subr.bf16.mxu0 %v2446_v35  ;;  %v2539_v32 = vld [vmem:[%s2797_s3 + $0xb8] sm:$0xff]   ;;  %v2541_v35 = vld [vmem:[%s2797_s3 + $0xb0] sm:$0xff]  }
  0x9e   :  { %1502 = vmatprep.subr.bf16.mxu1 %v2443_v34  ;;  %v2529_v34 = vld [vmem:[%s2797_s3 + $0x20] sm:$0xff]  }
  0xa0   :  { %1466 = vmatpush1.bf16.msra.mxu0 %v2444_v38  ;;  %v2542_v38 = vld [vmem:[%s2797_s3 + $0xe8] sm:$0xff]  }
  0xa1   :  { %1503 = vmatpush1.bf16.msra.mxu1 %v2441_v37  ;;  %1467 = vmatprep.subr.bf16.mxu0 %v2452_v39  ;;  %v2530_v37 = vld [vmem:[%s2797_s3 + $0x58] sm:$0xff]   ;;  %v2543_v39 = vld [vmem:[%s2797_s3 + $0xa8] sm:$0xff]  }
  0xa2   :  { %1504 = vmatprep.subr.bf16.mxu1 %v2449_v52  ;;  %v2531_v52 = vld [vmem:[%s2797_s3 + $0x18] sm:$0xff]  }
  0xa4   :  { %1468 = vmatpush1.bf16.msra.mxu0 %v2450_v41  ;;  %v2544_v41 = vld [vmem:[%s2797_s3 + $0xe0] sm:$0xff]  }
  0xa5   :  { %1505 = vmatpush1.bf16.msra.mxu1 %v2447_v40  ;;  %1469 = vmatprep.subr.bf16.mxu0 %v2458_v8  ;;  %v2532_v40 = vld [vmem:[%s2797_s3 + $0x50] sm:$0xff]   ;;  %v2534_v8 = vld [vmem:[%s2797_s3 + $0x48] sm:$0xff]  }
  0xa6   :  { %1506 = vmatprep.subr.bf16.mxu1 %v2455_v42  ;;  %v2533_v42 = vld [vmem:[%s2797_s3 + $0x10] sm:$0xff]  }
  0xa8   :  { %1470 = vmatpush1.bf16.msra.mxu0 %v2456_v44  ;;  %v2536_v44 = vld [vmem:[%s2797_s3 + $0x40] sm:$0xff]  }
  0xa9   :  { %1507 = vmatpush1.bf16.msra.mxu1 %v2453_v43  ;;  %1471 = vmatprep.subr.bf16.mxu0 %v2464_v46  ;;  %v2535_v43 = vld [vmem:[%s2797_s3 + $0x8] sm:$0xff]   ;;  %v2545_v46 = vld [vmem:[%s2797_s3 + $0xa0] sm:$0xff]  }
  0xaa   :  { %1508 = vmatprep.subr.bf16.mxu1 %v2461_v45  ;;  %v2537_v45 = vld [vmem:[%s2797_s3] sm:$0xff]  }
  0xac   :  { %1472 = vmatpush1.bf16.msra.mxu0 %v2462_v47 }
  0xad   :  { %1509 = vmatpush1.bf16.msra.mxu1 %v2459_v36  ;;  %1473 = vmatprep.subr.bf16.mxu0 %v2470_v49 }
  0xae   :  { %1510 = vmatprep.subr.bf16.mxu1 %v2467_v48 }
  0xb0   :  { %1474 = vmatpush2.bf16.msra.mxu0 %v2468_v51  ;;  %v2547_v51 = vld [vmem:[%s2797_s3 + $0x98] sm:$0xff]  }
  0xb1   :  { %1511 = vmatpush1.bf16.msra.mxu1 %v2465_v50  ;;  %1475 = vmatprep.subr.bf16.mxu0 %v2476_v54  ;;  %v2546_v50 = vld [vmem:[%s2797_s3 + $0xd8] sm:$0xff]  }
  0xb2   :  { %1512 = vmatprep.subr.bf16.mxu1 %v2473_v53 }
  0xb4   :  { %1476 = vmatpush2.bf16.msra.mxu0 %v2474_v56 }
  0xb5   :  { %1513 = vmatpush1.bf16.msra.mxu1 %v2471_v55  ;;  %1477 = vmatprep.subr.bf16.mxu0 %v2482_v58  ;;  %v2549_v58 = vld [vmem:[%s2797_s3 + $0x90] sm:$0xff]  }
  0xb6   :  { %1514 = vmatprep.subr.bf16.mxu1 %v2479_v57  ;;  %v2548_v57 = vld [vmem:[%s2797_s3 + $0xd0] sm:$0xff]  }
  0xb8   :  { %1478 = vmatpush2.bf16.msra.mxu0 %v2480_v60 }
  0xb9   :  { %1515 = vmatpush2.bf16.msra.mxu1 %v2477_v59  ;;  %1479 = vmatprep.subr.bf16.mxu0 %v2488_v62  ;;  %v2551_v62 = vld [vmem:[%s2797_s3 + $0x88] sm:$0xff]  }
  0xba   :  { %1516 = vmatprep.subr.bf16.mxu1 %v2485_v61  ;;  %v2550_v61 = vld [vmem:[%s2797_s3 + $0xc8] sm:$0xff]  }
  0xbc   :  { %1480 = vmatpush2.bf16.msra.mxu0 %v2486_v0 }
  0xbd   :  { %1517 = vmatpush2.bf16.msra.mxu1 %v2483_v63  ;;  %1481 = vmatprep.subr.bf16.mxu0 %v2494_v2  ;;  %v2553_v2 = vld [vmem:[%s2797_s3 + $0x80] sm:$0xff]  }
  0xbe   :  { %1518 = vmatprep.subr.bf16.mxu1 %v2491_v1  ;;  %v2552_v1 = vld [vmem:[%s2797_s3 + $0xc0] sm:$0xff]  }
  0xc0   :  { %1482 = vmatpush2.bf16.msra.mxu0 %v2492_v4 }
  0xc1   :  { %1519 = vmatpush2.bf16.msra.mxu1 %v2489_v3  ;;  %1483 = vmatprep.subr.bf16.mxu0 %v2500_v6  ;;  %v248_v3 = vlaneseq  ;;  %v246_v6 = vld [vmem:[%s2796_s2] sm:$0xf] }
  0xc2   :  { %1520 = vmatprep.subr.bf16.mxu1 %v2497_v5 }
  0xc3   :  { %v249_v4 = vshrl.u32 %v248_v3, 7 }
  0xc4   :  { %1484 = vmatpush2.bf16.msra.mxu0 %v2498_v10 }
  0xc5   :  { %1521 = vmatpush2.bf16.msra.mxu1 %v2495_v7  ;;  %1485 = vmatprep.subr.bf16.mxu0 %v2506_v12  ;;  %v250_v5 = vsub.s32 0, %v249_v4  ;;  %v254_v7 = vsub.s32 1, %v249_v4 }
  0xc6   :  { %1522 = vmatprep.subr.bf16.mxu1 %v2503_v11 }
  0xc7   :  { %v251_v10 = vrot.slane %v246_v6, %v250_v5  ;;  %v255_v11 = vrot.slane %v246_v6, %v254_v7 }
  0xc8   :  { %1486 = vmatpush2.bf16.msra.mxu0 %v2504_v14 }
  0xc9   :  { %1523 = vmatpush2.bf16.msra.mxu1 %v2501_v13  ;;  %1487 = vmatprep.subr.bf16.mxu0 %v2512_v17 }
  0xca   :  { %1524 = vmatprep.subr.bf16.mxu1 %v2509_v15 }
  0xcc   :  { %1488 = vmatpush2.bf16.msra.mxu0 %v2510_v21 }
  0xcd   :  { %1525 = vmatpush2.bf16.msra.mxu1 %v2507_v18  ;;  %1553 = vmatprep.subr.bf16.mxu0 %v2518_v23 }
  0xce   :  { %1526 = vmatprep.subr.bf16.mxu1 %v2515_v22 }
  0xcf   :  { %1490 = vmatmul.mubr.bf16.vlgmr.msra.gmra.mxu0 %v2656_v9  ;;  %v2525_v9 = vld [vmem:[%s2797_s3 + $0x30] sm:$0xff]  }
  0xd0   :  { %1554 = vmatpush1.bf16.msra.mxu0 %v2516_v25  ;;  %1571 = vmatprep.mubr.bf16.mxu0 %v2601_v16  ;;  %v2526_v16 = vld [vmem:[%s2797_s3 + $0x68] sm:$0xff]  }
  0xd1   :  { %1527 = vmatpush2.bf16.msra.mxu1 %v2513_v24  ;;  %2179 = vmatprep.subr.bf16.mxu0 %v2522_v27 }
  0xd2   :  { %1528 = vmatprep.subr.bf16.mxu1 %v2521_v26 }
  0xd5   :  { %1529 = vmatpush2.bf16.msra.mxu1 %v2519_v28 }
  0xd7   :  { %2145 = vmatmul.mubr.msk.bf16.vlgmr.msra.gmra.mxu0 %vm1248_vm0, %v2664_v19  ;;  %v2538_v19 = vld [vmem:[%s2797_s3 + $0xf8] sm:$0xff]  }
  0xd8   :  { %1531 = vmatmul.mubr.bf16.vlgmr.msra.gmra.mxu1 %v2678_v20  ;;  %2180 = vmatpush3.bf16.msra.mxu0 %v2523_v29  ;;  %v2528_v20 = vld [vmem:[%s2797_s3 + $0x60] sm:$0xff]  }
  0xd9   :  { %2181 = vmatprep.subr.bf16.mxu0 %v2524_v30  ;;  %2201 = vmatprep.subr.bf16.mxu1 %v2538_v19  ;;  %v258_v19 = vsub.s32 2, %v249_v4 }
  0xda   :  { %2202 = vmatpush3.bf16.msra.mxu1 %v2539_v32  ;;  %v262_v32 = vsub.s32 3, %v249_v4 }
  0xdb   :  { %2203 = vmatprep.subr.bf16.mxu1 %v2540_v33 }
  0xdc   :  { %2182 = vmatpush3.bf16.msra.mxu0 %v2525_v9 }
  0xdd   :  { %2183 = vmatprep.subr.bf16.mxu0 %v2526_v16 }
  0xde   :  { %2204 = vmatpush3.bf16.msra.mxu1 %v2541_v35 }
  0xdf   :  { %2205 = vmatprep.subr.bf16.mxu1 %v2542_v38 }
  0xe0   :  { %2184 = vmatpush3.bf16.msra.mxu0 %v2527_v31 }
  0xe1   :  { %2185 = vmatprep.subr.bf16.mxu0 %v2528_v20 }
  0xe2   :  { %2206 = vmatpush3.bf16.msra.mxu1 %v2543_v39 }
  0xe3   :  { %2207 = vmatprep.subr.bf16.mxu1 %v2544_v41 }
  0xe4   :  { %2186 = vmatpush3.bf16.msra.mxu0 %v2529_v34  ;;  %v259_v34 = vrot.slane %v246_v6, %v258_v19 }
  0xe5   :  { %2187 = vmatprep.subr.bf16.mxu0 %v2530_v37  ;;  %v263_v37 = vrot.slane %v246_v6, %v262_v32 }
  0xe6   :  { %2208 = vmatpush3.bf16.msra.mxu1 %v2545_v46 }
  0xe7   :  { %2209 = vmatprep.subr.bf16.mxu1 %v2546_v50 }
  0xe8   :  { %2188 = vmatpush3.bf16.msra.mxu0 %v2531_v52 }
  0xe9   :  { %2189 = vmatprep.subr.bf16.mxu0 %v2532_v40 }
  0xea   :  { %2210 = vmatpush3.bf16.msra.mxu1 %v2547_v51 }
  0xeb   :  { %2211 = vmatprep.subr.bf16.mxu1 %v2548_v57 }
  0xec   :  { %2190 = vmatpush3.bf16.msra.mxu0 %v2533_v42 }
  0xed   :  { %2191 = vmatprep.subr.bf16.mxu0 %v2534_v8 }
  0xee   :  { %2212 = vmatpush3.bf16.msra.mxu1 %v2549_v58 }
  0xef   :  { %2213 = vmatprep.subr.bf16.mxu1 %v2550_v61 }
  0xf0   :  { %2192 = vmatpush3.bf16.msra.mxu0 %v2535_v43 }
  0xf1   :  { %2193 = vmatprep.subr.bf16.mxu0 %v2536_v44 }
  0xf2   :  { %2214 = vmatpush3.bf16.msra.mxu1 %v2551_v62 }
  0xf3   :  { %2215 = vmatprep.subr.bf16.mxu1 %v2552_v1 }
  0xf4   :  { %2194 = vmatpush3.bf16.msra.mxu0 %v2537_v45 }
  0xf6   :  { %2216 = vmatpush3.bf16.msra.mxu1 %v2553_v2 }
 0x10f   :  { %v1286_v36 = vpop.f32.mrf.mxu0 }
 0x110   :  { %v1327_v47 = vpop.f32.mrf.mxu1  ;;  %v1287_v12 = vadd.f32 %v1286_v36, %v251_v10 }
 0x111   :  { %v1288_v48 = vpop.f32.mrf.mxu0 }
 0x112   :  { %v1329_v49 = vpop.f32.mrf.mxu1  ;;  %v1289_v13 = vadd.f32 %v1288_v48, %v255_v11  ;;  %v1328_v14 = vadd.f32 %v1327_v47, %v1287_v12 }
 0x113   :  { %v1290_v53 = vpop.f32.mrf.mxu0 }
 0x114   :  { %v1331_v54 = vpop.f32.mrf.mxu1  ;;  %v1330_v17 = vadd.f32 %v1329_v49, %v1289_v13 }
 0x115   :  { %v1291_v55 = vpop.f32.mrf.mxu0 }
 0x116   :  { %v1332_v56 = vpop.f32.mrf.mxu1 }
 0x118   :  { %v1409_v59 = vpop.f32.mrf.mxu1 }
 0x11a   :  { %v1411_v60 = vpop.f32.mrf.mxu1 }
 0x11c   :  { %v1413_v63 = vpop.f32.mrf.mxu1 }
 0x11d   :  { %v2146_v63 = vld [vmem:[%s2798_s4] ss:$0 sm:$0xff] }
 0x11e   :  { %v1414_v0 = vpop.f32.mrf.mxu1 }
 0x14f   :  { %v1368_v15 = vpop.f32.mrf.mxu0 }
 0x150   :  { %v1369_v18 = vadd.f32 %v1368_v15, %v1328_v14 }
 0x151   :  { %v1370_v21 = vpop.f32.mrf.mxu0 }
 0x152   :  { %v1410_v22 = vadd.f32 %v1409_v59, %v1369_v18  ;;  %v1371_v23 = vadd.f32 %v1370_v21, %v1330_v17 }
 0x153   :  { %v1372_v24 = vpop.f32.mrf.mxu0 }
 0x154   :  { %v1412_v25 = vadd.f32 %v1411_v60, %v1371_v23  ;;  %v1580_v26 = vmax.f32 %v1410_v22, 0.0 }
 0x155   :  { %v1373_v27 = vpop.f32.mrf.mxu0 }
 0x156   :  { %v1581_v28 = vmax.f32 %v1412_v25, 0.0  ;;  %v1584_v9 = vpack.c.bf16 %v1580_v26, %v1580_v26 }
 0x158   :  { %v1450_v29 = vpop.f32.mrf.mxu1  ;;  %v1585_v30 = vpack.c.bf16 %v1581_v28, %v1581_v28 }
 0x159   :  { %v1451_v52 = vadd.f32 %v1450_v29, %v259_v34 }
 0x15a   :  { %v1452_v16 = vpop.f32.mrf.mxu1  ;;  %1883 = vmatprep.mubr.bf16.mxu0 %v1585_v30 }
 0x15b   :  { %1884 = vmatmul.mubr.bf16.vlgmr.msra.gmra.mxu0 %v1584_v9  ;;  %v1453_v40 = vadd.f32 %v1452_v16, %v263_v37 }
 0x15c   :  { %v1454_v31 = vpop.f32.mrf.mxu1 }
 0x15e   :  { %v1455_v20 = vpop.f32.mrf.mxu1 }
 0x18f   :  { %v1491_v33 = vpop.f32.mrf.mxu0 }
 0x190   :  { %v1492_v41 = vadd.f32 %v1491_v33, %v1451_v52 }
 0x191   :  { %v1493_v35 = vpop.f32.mrf.mxu0 }
 0x192   :  { %v1494_v43 = vadd.f32 %v1493_v35, %v1453_v40 }
 0x193   :  { %v1495_v38 = vpop.f32.mrf.mxu0 }
 0x195   :  { %v1496_v39 = vpop.f32.mrf.mxu0 }
 0x197   :  { %v1573_v8 = vpop.f32.mrf.mxu0 }
 0x198   :  { %v1532_v42 = vpop.f32.mrf.mxu1 }
 0x199   :  { %v1533_v44 = vadd.f32 %v1532_v42, %v1492_v41  ;;  %v1575_v46 = vpop.f32.mrf.mxu0 }
 0x19a   :  { %v1534_v45 = vpop.f32.mrf.mxu1 }
 0x19b   :  { %v1574_v36 = vadd.f32 %v1573_v8, %v1533_v44  ;;  %v1535_v47 = vadd.f32 %v1534_v45, %v1494_v43  ;;  %v1577_v49 = vpop.f32.mrf.mxu0 }
 0x19c   :  { %v1536_v48 = vpop.f32.mrf.mxu1 }
 0x19d   :  { %v1576_v50 = vadd.f32 %v1575_v46, %v1535_v47  ;;  %v1582_v51 = vmax.f32 %v1574_v36, 0.0  ;;  %v1578_v54 = vpop.f32.mrf.mxu0 }
 0x19e   :  { %v1537_v53 = vpop.f32.mrf.mxu1 }
 0x19f   :  { %v1583_v55 = vmax.f32 %v1576_v50, 0.0  ;;  %v1586_v57 = vpack.c.bf16 %v1582_v51, %v1582_v51 }
 0x1a1   :  { %v1587_v56 = vpack.c.bf16 %v1583_v55, %v1583_v55 }
 0x1a3   :  { %1923 = vmatprep.mubr.bf16.mxu1 %v1587_v56 }
 0x1a4   :  { %1924 = vmatmul.mubr.bf16.vlgmr.msra.gmra.mxu1 %v1586_v57 }
 0x21b   :  { %v2195_v58 = vpop.f32.mrf.mxu0 }
 0x21d   :  { %v2196_v59 = vpop.f32.mrf.mxu0 }
 0x21e   :  { %v2197_v60 = vadd.f32 %v2196_v59, %v2195_v58 }
 0x21f   :  { %v2198_v61 = vpop.f32.mrf.mxu0 }
 0x220   :  { %v1886_v2 = vadd.f32 %v2197_v60, %v2146_v63 }
 0x221   :  { %v2199_v62 = vpop.f32.mrf.mxu0 }
 0x264   :  { %v2217_v0 = vpop.f32.mrf.mxu1 }
 0x266   :  { %v2218_v1 = vpop.f32.mrf.mxu1 }
 0x267   :  { %v2219_v3 = vadd.f32 %v2218_v1, %v2217_v0 }
 0x268   :  { %v2220_v4 = vpop.f32.mrf.mxu1 }
 0x269   :  { %v1926_v5 = vadd.f32 %v2219_v3, %v1886_v2 }
 0x26a   :  { %v2221_v6 = vpop.f32.mrf.mxu1 }
 0x26b   :  { %v1931_v7 = vmax.f32 %v1926_v5, 0.0 }
 0x26d   :  { %1932 = vst [vmem:[#allocation5] sm:$0xff] %v1931_v7 }
 0x26e   :  { %2585 = shalt.err (!%p2582_p9)
}
 0x26f   :  { %1942 = dma.vmem_to_hbm [thread:$0]  %s1940_s1, 128, %s2799_s5, [#allocation4]  }
 0x270   :  { %2596 = dma.done.wait [#allocation4], 128  }
 0x271   :  { %2597 = vsyncadd [#allocation4], 4294967168 }
 0x272   :  { %1946 = vsyncpa [#allocation3], 1 }
 0x273   :  { %1947 = vsyncpa [#allocation4], 1 }

</bundles_post_ra>
